<compile_context>
chip_gen: v6e
topology: v6e:2x2x1
jax: 0.10.0
libtpu: 0.0.40
codegen_flags: <defaults>
</compile_context>

<pallas_src>
import math

import jax
import jax.numpy as jnp
from jax.experimental import pallas as pl
from jax.experimental.pallas import tpu as pltpu


def _affine_kernel(scale_ref, shift_ref, x_ref, o_ref):
    # (TR,1) * (TR,TS) + (TR,1): per-row scale/shift broadcast along lanes.
    o_ref[...] = (scale_ref[...] * x_ref[...] + shift_ref[...]).astype(o_ref.dtype)


def _add_kernel(shift_ref, x_ref, o_ref):
    # (TR,TS) + (TR,1): per-row shift broadcast along lanes.
    o_ref[...] = (x_ref[...] + shift_ref[...]).astype(o_ref.dtype)


def _round_down(x, m):
    return (x // m) * m


def _device_plan():
    """Returns (target block bytes, vmem_limit_bytes or None) per TPU generation."""
    kind = ""
    try:
        kind = jax.devices()[0].device_kind.lower()
    except Exception:
        pass
    if "v7" in kind:
        # 64 MiB physical VMEM (32 MiB scoped default), ~3.2 TB/s HBM:
        # bigger blocks amortize the ~0.35us step overhead; raise the scoped limit.
        return 6 << 20, 48 << 20
    if "v6" in kind:
        # 4 MiB blocks * (2 x-in + 2 out double buffers) = 16 MiB < 32 MiB scoped default.
        return 4 << 20, None
    if "v5 lite" in kind or "v5e" in kind or "v5lite" in kind:
        # 2 MiB blocks stay comfortably under the 16 MiB scoped default.
        return 2 << 20, None
    return 2 << 20, None  # conservative fallback (v4 / v5p / unknown)


def _select_tiles(R, S, itemsize, block_bytes):
    """Byte-targeted (TR, TS) that obeys the (sublane, 128) BlockSpec rule."""
    sub = max(8, 32 // itemsize)  # sublane multiple: 8 (f32), 16 (bf16), 32 (int8)

    # Lane tile first: lane-dense stores are the biggest single lever.
    lane_budget = max(128, block_bytes // (sub * itemsize))
    if S <= lane_budget:
        TS = S                                      # full dim -> always legal
    else:
        TS = max(128, _round_down(min(S, lane_budget), 128))

    # Rows to fill the remaining byte budget given TS.
    row_budget = max(sub, block_bytes // (TS * itemsize))
    if R <= row_budget:
        TR = R                                      # full dim -> always legal
    else:
        TR = max(sub, _round_down(min(R, row_budget), sub))

    # If everything collapsed to a single block but there is real traffic,
    # split the lane (or row) axis so the grid can shard across v7x's 2 TCs.
    n_blocks = -(-R // TR) * -(-S // TS)
    if n_blocks < 2 and R * S * itemsize >= (1 << 20):
        if S >= 256:
            TS = max(128, _round_down(-(-S // 2), 128))
        elif R >= 2 * sub:
            TR = max(sub, _round_down(-(-R // 2), sub))
    return TR, TS


def feature_wise_affine(x, noise_embed, weight, bias, *, use_affine_level=False,
                        block_bytes=None):
    """SR3 FeatureWiseAffine forward.

    x: (B, C, *spatial) float; noise_embed: (B, Cin);
    weight: (Cin, C*(1+use_affine_level))  (i.e. torch W^T); bias: (C*(1+...),).
    """
    B, C = x.shape[0], x.shape[1]
    S = math.prod(x.shape[2:])
    R = B * C
    x_flat = x.reshape(R, S)

    # Hoisted noise_func: one small XLA matmul (f32) for the whole batch.
    y = (noise_embed.astype(jnp.float32) @ weight.astype(jnp.float32)
         + bias.astype(jnp.float32))                      # (B, C*(1+affine))
    if use_affine_level:
        scale = (1.0 + y[:, :C]).reshape(R, 1).astype(x.dtype)   # 1 + gamma, per row
        shift = y[:, C:].reshape(R, 1).astype(x.dtype)           # beta, per row
    else:
        shift = y.reshape(R, 1).astype(x.dtype)

    target_bytes, vmem_limit = _device_plan()
    if block_bytes is not None:
        target_bytes = int(block_bytes)
    itemsize = jnp.dtype(x.dtype).itemsize
    TR, TS = _select_tiles(R, S, itemsize, target_bytes)

    # s last / fastest-varying: the (TR,1) columns (index_map (r,0)) are only
    # re-fetched when the row tile changes.
    grid = (pl.cdiv(R, TR), pl.cdiv(S, TS))

    col_spec = pl.BlockSpec((TR, 1), lambda r, s: (r, 0))
    x_spec = pl.BlockSpec((TR, TS), lambda r, s: (r, s))

    if use_affine_level:
        kernel = _affine_kernel
        operands = (scale, shift, x_flat)
        in_specs = [col_spec, col_spec, x_spec]
    else:
        kernel = _add_kernel
        operands = (shift, x_flat)
        in_specs = [col_spec, x_spec]

    cp_kwargs = dict(dimension_semantics=("parallel", "parallel"))
    if vmem_limit is not None:
        cp_kwargs["vmem_limit_bytes"] = vmem_limit

    out_flat = pl.pallas_call(
        kernel,
        out_shape=jax.ShapeDtypeStruct((R, S), x.dtype),
        grid_spec=pltpu.PrefetchScalarGridSpec(
            num_scalar_prefetch=0,
            grid=grid,
            in_specs=in_specs,
            out_specs=x_spec,
        ),
        compiler_params=pltpu.CompilerParams(**cp_kwargs),
    )(*operands)
    return out_flat.reshape(x.shape)


def _reference(x, noise_embed, weight, bias, use_affine_level):
    """Pure-JAX reference mirroring the torch module (f32 linear)."""
    B, C = x.shape[0], x.shape[1]
    y = (noise_embed.astype(jnp.float32) @ weight.astype(jnp.float32)
         + bias.astype(jnp.float32))
    bshape = (B, -1) + (1,) * (x.ndim - 2)
    xf = x.astype(jnp.float32)
    if use_affine_level:
        gamma = y[:, :C].reshape(bshape)
        beta = y[:, C:].reshape(bshape)
        return (1.0 + gamma) * xf + beta
    return xf + y.reshape(bshape)


if __name__ == "__main__":
    key = jax.random.PRNGKey(0)
    k_x, k_n, k_w1, k_b1, k_w2, k_b2 = jax.random.split(key, 6)

    B, C, D, H, W = 2, 4, 4, 8, 8     # small NCDHW activations, S = 256
    Cin = 32                          # noise embedding dim (in_channels)

    x = jax.random.normal(k_x, (B, C, D, H, W), dtype=jnp.float32)
    noise_embed = jax.random.normal(k_n, (B, Cin), dtype=jnp.float32)

    # Deterministic synthetic Linear params (stored as (in, out) = torch W^T).
    w_add = jax.random.normal(k_w1, (Cin, C), dtype=jnp.float32) * 0.1
    b_add = jax.random.normal(k_b1, (C,), dtype=jnp.float32) * 0.1
    w_aff = jax.random.normal(k_w2, (Cin, 2 * C), dtype=jnp.float32) * 0.1
    b_aff = jax.random.normal(k_b2, (2 * C,), dtype=jnp.float32) * 0.1

    # 1) Additive branch (module default, use_affine_level=False)
    out_add = jax.block_until_ready(
        feature_wise_affine(x, noise_embed, w_add, b_add, use_affine_level=False))
    ref_add = _reference(x, noise_embed, w_add, b_add, False)
    assert jnp.allclose(out_add, ref_add, atol=1e-5, rtol=1e-5)

    # 2) Affine branch (use_affine_level=True)
    out_aff = jax.block_until_ready(
        feature_wise_affine(x, noise_embed, w_aff, b_aff, use_affine_level=True))
    ref_aff = _reference(x, noise_embed, w_aff, b_aff, True)
    assert jnp.allclose(out_aff, ref_aff, atol=1e-5, rtol=1e-5)

    # 3) Forced multi-tile grid (tiny 4 KiB blocks -> grid (1,2)) to exercise
    #    the pipelined multi-block path.
    out_tiled = jax.block_until_ready(
        feature_wise_affine(x, noise_embed, w_aff, b_aff, use_affine_level=True,
                            block_bytes=4096))
    assert jnp.allclose(out_tiled, ref_aff, atol=1e-5, rtol=1e-5)

    # 4) Non-128-multiple flattened spatial (S = 3*4*8 = 96): full-dim lane block.
    x_odd = jax.random.normal(k_x, (B, C, 3, 4, 8), dtype=jnp.float32)
    out_odd = jax.block_until_ready(
        feature_wise_affine(x_odd, noise_embed, w_aff, b_aff, use_affine_level=True))
    ref_odd = _reference(x_odd, noise_embed, w_aff, b_aff, True)
    assert jnp.allclose(out_odd, ref_odd, atol=1e-5, rtol=1e-5)

    # 5) bf16 activations: packed bf16 body (scale/shift cast to x.dtype).
    x_bf = x.astype(jnp.bfloat16)
    out_bf = jax.block_until_ready(
        feature_wise_affine(x_bf, noise_embed, w_aff, b_aff, use_affine_level=True))
    ref_bf = _reference(x_bf, noise_embed, w_aff, b_aff, True)
    assert jnp.allclose(out_bf.astype(jnp.float32), ref_bf, atol=5e-2, rtol=5e-2)

    print("KERNEL_OK")
</pallas_src>

<mosaic_0001>
module attributes {stable_mosaic.version = 11 : i64} {
  func.func @_add_kernel(%arg0: i32, %arg1: i32, %arg2: memref<8x1xf32, #tpu.memory_space<vmem>>, %arg3: memref<8x256xf32, #tpu.memory_space<vmem>>, %arg4: memref<8x256xf32, #tpu.memory_space<vmem>>) attributes {dimension_semantics = [#tpu.dimension_semantics<parallel>, #tpu.dimension_semantics<parallel>], iteration_bounds = array<i64: 1, 1>, scalar_prefetch = 0 : i64, scratch_operands = 0 : i64, tpu.core_type = #tpu.core_type<tc>, window_params = [{transform_indices = @transform_0, window_bounds = array<i64: 8, 1>}, {transform_indices = @transform_1, window_bounds = array<i64: 8, 256>}, {transform_indices = @transform_2, window_bounds = array<i64: 8, 256>}]} {
    %c0 = arith.constant 0 : index
    %c0_0 = arith.constant 0 : index
    %0 = vector.load %arg3[%c0, %c0_0] : memref<8x256xf32, #tpu.memory_space<vmem>>, vector<8x256xf32>
    %c0_1 = arith.constant 0 : index
    %c0_2 = arith.constant 0 : index
    %1 = vector.load %arg2[%c0_1, %c0_2] : memref<8x1xf32, #tpu.memory_space<vmem>>, vector<8x1xf32>
    %2 = vector.broadcast %1 : vector<8x1xf32> to vector<8x256xf32>
    %3 = arith.addf %0, %2 : vector<8x256xf32>
    %c0_3 = arith.constant 0 : index
    %c0_4 = arith.constant 0 : index
    %4 = vector.load %arg4[%c0_3, %c0_4] : memref<8x256xf32, #tpu.memory_space<vmem>>, vector<8x256xf32>
    tpu.vector_store %arg4[%c0_3, %c0_4], %3 {strides = array<i32>} : memref<8x256xf32, #tpu.memory_space<vmem>>, vector<8x256xf32>,
    return
  }
  func.func @transform_0(%arg0: i32, %arg1: i32) -> (i32, i32) {
    %c0_i32 = arith.constant 0 : i32
    %c0_i32_0 = arith.constant 0 : i32
    return %arg0, %c0_i32 : i32, i32
  }
  func.func @transform_1(%arg0: i32, %arg1: i32) -> (i32, i32) {
    %c0_i32 = arith.constant 0 : i32
    return %arg0, %arg1 : i32, i32
  }
  func.func @transform_2(%arg0: i32, %arg1: i32) -> (i32, i32) {
    %c0_i32 = arith.constant 0 : i32
    return %arg0, %arg1 : i32, i32
  }
}

</mosaic_0001>

<bundles_post_ra>
// kernel: tpu_custom_call.1
= control target key start
LH: loop header
LB: loop body
LE: loop exit
PB: predicated region body
PF: predicated region fallthrough
CT: control target
= control target key end

     0   :  { %7 = vsyncpa [#allocation3], 0  ;;  %s126_s0 = inlined_call_operand.vmem [shape: f32[8,1], index: 0, kind: input, shape index: {}]   ;;  %s127_s1 = inlined_call_operand.hbm [shape: f32[8,256], index: 1, kind: input, shape index: {}]   ;;  %s128_s2 = inlined_call_operand.hbm [shape: f32[8,256], index: 2, kind: output, shape index: {}]  }
   0x1   :  { %8 = vsyncpa [#allocation4], 0  ;;  %s99_s9 = smov [#allocation2]  }
   0x2   :  { %s17_s10 = sshll.u32 %s99_s9, 4  ;;  %s18_s10 = int_to_ptr.vmem [resolvable:$true] %s17_s10 }
   0x3   :  { %s63_s11 = scalar_lea.vmem %s18_s10, 256  ;;  %p68_p1 = scmp.lt.s32.totalorder %s18_s10, %s18_s10 }
   0x4   :  { %p64_p0 = scmp.ne.s32.totalorder %s18_s10, %s63_s11  ;;  %p69_p2 = scmp.lt.s32.totalorder %s63_s11, %s63_s11 }
   0x6   :  { %p70_p3 = por %p69_p2, %p68_p1 }
   0x8   :  { %p71_p4 = pnand %p70_p3, %p64_p0 }
   0xa   :  { %74 = shalt.err (!%p71_p4)
}
   0xb   :  { %20 = dma.hbm_to_vmem [thread:$0]  %s127_s1, 256, %s18_s10, [#allocation3]  }
   0xc   :  { %95 = dma.done.wait [#allocation3], 256  }
   0xd   :  { %96 = vsyncadd [#allocation3], 4294967040  ;;  %v100_v0 = vmov 0   ;;  %v26_v1 = vld [vmem:[%s126_s0] sm:$0xff]  ;;  %v25_v3 = vld [vmem:[#allocation2 + $0x8] sm:$0xff]  ;;  %s101_s16 = smov [#allocation5]  }
   0xe   :  { %54 = vset.pattern.permute.xlu0 %v100_v0  ;;  %v24_v2 = vld [vmem:[#allocation2] sm:$0xff]  ;;  %s42_s17 = sshll.u32 %s101_s16, 4  ;;  %s43_s17 = int_to_ptr.vmem [resolvable:$true] %s42_s17 }
   0xf   :  { %29 = vperm.xlu0 %54, %v26_v1   ;;  %s75_s1 = scalar_lea.vmem %s43_s17, 256  ;;  %p80_p6 = scmp.lt.s32.totalorder %s43_s17, %s43_s17 }
  0x10   :  { %p76_p5 = scmp.ne.s32.totalorder %s43_s17, %s75_s1  ;;  %p81_p7 = scmp.lt.s32.totalorder %s75_s1, %s75_s1 }
  0x12   :  { %p82_p8 = por %p81_p7, %p80_p6 }
  0x14   :  { %p83_p9 = pnand %p82_p8, %p76_p5 }
  0x8a   :  { %v30_v4 = vpop.permute.xlu0 %29 }
  0x8b   :  { %v32_v5 = vadd.f32 %v30_v4, %v24_v2  ;;  %v33_v6 = vadd.f32 %v30_v4, %v25_v3 }
  0x8d   :  { %34 = vst [vmem:[#allocation5] sm:$0xff] %v32_v5  ;;  %35 = vst [vmem:[#allocation5 + $0x8] sm:$0xff] %v33_v6 }
  0x8e   :  { %86 = shalt.err (!%p83_p9)
}
  0x8f   :  { %45 = dma.vmem_to_hbm [thread:$0]  %s43_s17, 256, %s128_s2, [#allocation4]  }
  0x90   :  { %97 = dma.done.wait [#allocation4], 256  }
  0x91   :  { %98 = vsyncadd [#allocation4], 4294967040 }
  0x92   :  { %49 = vsyncpa [#allocation3], 1 }
  0x93   :  { %50 = vsyncpa [#allocation4], 1 }

</bundles_post_ra>
